<compile_context>
chip_gen: v6e
topology: v6e:2x2x1
jax: 0.10.0
libtpu: 0.0.40
codegen_flags: <defaults>
</compile_context>

<pallas_src>
import functools
import math

import jax
import jax.numpy as jnp
from jax import lax
from jax.experimental import pallas as pl
from jax.experimental.pallas import tpu as pltpu

_LANE = 128
_SUBLANE = 8


def _attn_kernel(scale, has_mask, *refs):
    if has_mask:
        q_ref, k_ref, v_ref, m_ref, o_ref = refs
    else:
        q_ref, k_ref, v_ref, o_ref = refs
        m_ref = None

    # Fold the softmax scale into Q (commutes with the multiplicative mask):
    # replaces a (Bt, P) VPU multiply with a (Bt, Dk) one, MXU inputs stay in
    # their native dtype.
    q = q_ref[...] * jnp.asarray(scale, dtype=q_ref.dtype)     # (Bt, 1, Dk)
    k = k_ref[...]                                              # (Bt, Dk, P)
    v = v_ref[...]                                              # (Bt, Dv, P)

    # energy[b, 0, p] = sum_d q[b, 0, d] * k[b, d, p]; f32 MXU accumulation.
    energy = lax.dot_general(
        q, k,
        dimension_numbers=(((2,), (1,)), ((0,), (0,))),
        preferred_element_type=jnp.float32)                     # (Bt, 1, P) f32

    # Multiplicative mask applied BEFORE softmax (exact torch ordering).
    if has_mask:
        energy = energy * m_ref[...].astype(jnp.float32)

    # Numerically stable softmax over P (f32 on the VPU/EUP path).
    logits = energy - jnp.max(energy, axis=-1, keepdims=True)
    p = jnp.exp(logits)                                         # (Bt, 1, P)
    denom = jnp.sum(p, axis=-1, keepdims=True)                  # (Bt, 1, 1)

    # out[b, 0, v] = sum_p p[b, 0, p] * V[b, v, p]; contraction over the shared
    # last axis -> no transpose of V needed.
    out = lax.dot_general(
        p.astype(v_ref.dtype), v,
        dimension_numbers=(((2,), (2,)), ((0,), (0,))),
        preferred_element_type=jnp.float32)                     # (Bt, 1, Dv)

    # Exact normalization: denom is tiny, so a plain divide is free and keeps
    # bit-level parity with the reference softmax.
    o_ref[...] = (out / denom).astype(o_ref.dtype)


def _round_up(x, m):
    return ((x + m - 1) // m) * m


def _default_vmem_limit_bytes():
    """Generation-aware VMEM limit (leave headroom for compiler scratch)."""
    try:
        cap = int(pltpu.get_tpu_info().vmem_capacity_bytes)
    except Exception:
        cap = 64 * 1024 * 1024  # conservative: v7x per-TensorCore physical VMEM
    # ~60% of physical: v7x (64 MiB) -> ~38 MiB; v5e/v6e (128 MiB) -> cap 64 MiB.
    return int(max(32 * 1024 * 1024, min(int(cap * 0.6), 64 * 1024 * 1024)))


def _choose_batch_block(B, Dk, Dv, P, itemsize, mask_itemsize, has_mask,
                        vmem_limit_bytes, min_steps=8):
    """Pick the per-grid-step batch tile Bt.

    Accounts for (8, 128) tile padding on every VMEM block and the f32 softmax
    intermediates, keeps 2x double-buffered tiles under ~75% of the VMEM limit,
    and keeps >= min_steps grid steps for pipelining / v7x megacore sharding.
    """
    p_l = _round_up(P, _LANE)
    dk_l = _round_up(Dk, _LANE)
    dv_l = _round_up(Dv, _LANE)
    dk_s = _round_up(Dk, _SUBLANE)
    dv_s = _round_up(Dv, _SUBLANE)

    # Streamed (double-buffered) per-batch-element bytes: Q, K, V, (mask), out.
    stream = (_SUBLANE * dk_l + dk_s * p_l + dv_s * p_l + _SUBLANE * dv_l) * itemsize
    if has_mask:
        stream += _SUBLANE * p_l * mask_itemsize
    # In-kernel f32 intermediates: energy/logits/p (f32), p cast, f32 out.
    interm = _SUBLANE * p_l * (3 * 4 + itemsize) + _SUBLANE * dv_l * 4

    budget = int(vmem_limit_bytes * 0.75)
    per_b = 2 * stream + interm
    bt_fit = max(1, budget // max(per_b, 1))

    # Keep >= min_steps grid steps (pipeline overlap; both TCs on v7x) but never
    # shrink a step below the sublane pack for that reason alone.
    bt_steps = max(pl.cdiv(B, min_steps), _SUBLANE)
    bt = int(max(1, min(bt_fit, bt_steps, B)))

    if bt >= B:
        return B
    # Prefer a tile that divides B exactly (no ragged / garbage tail block),
    # without giving up more than ~half the tile size.
    for cand in range(bt, max(bt // 2, _SUBLANE - 1), -1):
        if B % cand == 0:
            return cand
    if bt >= _SUBLANE:
        return (bt // _SUBLANE) * _SUBLANE
    return bt


def dot_product_attention(Q, K, V, mask=None, *, batch_block=None,
                          vmem_limit_bytes=None):
    """Pallas wrapper. Q:[B,Dk], K:[B,Dk,P], V:[B,Dv,P], mask:[B,P] or None -> [B,Dv]."""
    B, Dk = Q.shape
    _, _, P = K.shape
    Dv = V.shape[1]
    scale = 1.0 / math.sqrt(Dk)
    has_mask = mask is not None

    if vmem_limit_bytes is None:
        vmem_limit_bytes = _default_vmem_limit_bytes()

    itemsize = jnp.dtype(Q.dtype).itemsize
    if has_mask:
        # bool masks follow torch `.float()`; otherwise keep the native (possibly
        # narrow) dtype — the f32 cast happens in-kernel, hidden under the DMA.
        if mask.dtype == jnp.bool_:
            mask = mask.astype(jnp.float32)
        mask_itemsize = jnp.dtype(mask.dtype).itemsize
    else:
        mask_itemsize = 0

    Bt = batch_block if batch_block is not None else _choose_batch_block(
        B, Dk, Dv, P, itemsize, mask_itemsize, has_mask, vmem_limit_bytes)
    Bt = int(max(1, min(Bt, B)))
    grid = (pl.cdiv(B, Bt),)

    # Carry the singleton "query row" axis explicitly so every block's last two
    # dims equal the full array dims (TPU (8,128) tiling rule satisfied); Bt
    # lives on an unconstrained leading dim. The wrapper reshapes are
    # metadata-only (unit-dim insertions).
    Q3 = Q.reshape(B, 1, Dk)

    in_specs = [
        pl.BlockSpec((Bt, 1, Dk), lambda b: (b, 0, 0)),
        pl.BlockSpec((Bt, Dk, P), lambda b: (b, 0, 0)),
        pl.BlockSpec((Bt, Dv, P), lambda b: (b, 0, 0)),
    ]
    args = [Q3, K, V]
    if has_mask:
        in_specs.append(pl.BlockSpec((Bt, 1, P), lambda b: (b, 0, 0)))
        args.append(mask.reshape(B, 1, P))

    bytes_accessed = B * (Dk + Dk * P + Dv * P + Dv) * itemsize
    if has_mask:
        bytes_accessed += B * P * mask_itemsize
    cost = pl.CostEstimate(
        flops=int(2 * B * P * (Dk + Dv)),
        transcendentals=int(B * P),
        bytes_accessed=int(bytes_accessed))

    kernel = functools.partial(_attn_kernel, scale, has_mask)

    out3 = pl.pallas_call(
        kernel,
        out_shape=jax.ShapeDtypeStruct((B, 1, Dv), Q.dtype),
        grid_spec=pltpu.PrefetchScalarGridSpec(
            num_scalar_prefetch=0,
            grid=grid,
            in_specs=in_specs,
            out_specs=pl.BlockSpec((Bt, 1, Dv), lambda b: (b, 0, 0)),
        ),
        compiler_params=pltpu.CompilerParams(
            dimension_semantics=("parallel",),
            vmem_limit_bytes=int(vmem_limit_bytes)),
        cost_estimate=cost,
    )(*args)

    return out3.reshape(B, Dv)


def _reference(Q, K, V, mask=None):
    scale = 1.0 / math.sqrt(Q.shape[1])
    energy = jnp.einsum("bd,bdp->bp", Q, K)
    if mask is not None:
        energy = energy * mask.astype(jnp.float32)
    attn = jax.nn.softmax(energy * scale, axis=-1)
    return jnp.einsum("bp,bvp->bv", attn, V)


if __name__ == "__main__":
    key = jax.random.PRNGKey(0)
    B, Dk, Dv, P = 2, 32, 16, 8
    kq, kk, kv, km = jax.random.split(key, 4)
    Q = jax.random.normal(kq, (B, Dk), dtype=jnp.float32)
    K = jax.random.normal(kk, (B, Dk, P), dtype=jnp.float32)
    V = jax.random.normal(kv, (B, Dv, P), dtype=jnp.float32)
    mask = (jax.random.uniform(km, (B, P)) > 0.3).astype(jnp.float32)

    out = dot_product_attention(Q, K, V, mask)
    jax.block_until_ready(out)

    ref = _reference(Q, K, V, mask)
    assert out.shape == (B, Dv)
    assert jnp.allclose(out, ref, atol=1e-3, rtol=1e-3), "mismatch vs reference"

    # also exercise the specialized mask=None kernel
    out_nomask = dot_product_attention(Q, K, V, None)
    jax.block_until_ready(out_nomask)
    assert jnp.allclose(out_nomask, _reference(Q, K, V, None),
                        atol=1e-3, rtol=1e-3)

    print("KERNEL_OK")
</pallas_src>

<mosaic_0001>
module attributes {stable_mosaic.version = 11 : i64} {
  func.func @_attn_kernel(%arg0: i32, %arg1: memref<2x1x32xf32, #tpu.memory_space<vmem>>, %arg2: memref<2x32x8xf32, #tpu.memory_space<vmem>>, %arg3: memref<2x16x8xf32, #tpu.memory_space<vmem>>, %arg4: memref<2x1x8xf32, #tpu.memory_space<vmem>>, %arg5: memref<2x1x16xf32, #tpu.memory_space<vmem>>) attributes {dimension_semantics = [#tpu.dimension_semantics<parallel>], iteration_bounds = array<i64: 1>, scalar_prefetch = 0 : i64, scratch_operands = 0 : i64, tpu.core_type = #tpu.core_type<tc>, window_params = [{transform_indices = @transform_0, window_bounds = array<i64: 2, 1, 32>}, {transform_indices = @transform_1, window_bounds = array<i64: 2, 32, 8>}, {transform_indices = @transform_2, window_bounds = array<i64: 2, 16, 8>}, {transform_indices = @transform_3, window_bounds = array<i64: 2, 1, 8>}, {transform_indices = @transform_4, window_bounds = array<i64: 2, 1, 16>}]} {
    %c0 = arith.constant 0 : index
    %c0_0 = arith.constant 0 : index
    %c0_1 = arith.constant 0 : index
    %0 = vector.load %arg1[%c0, %c0_0, %c0_1] : memref<2x1x32xf32, #tpu.memory_space<vmem>>, vector<2x1x32xf32>
    %cst = arith.constant 0.176776692 : f32
    %1 = vector.broadcast %cst : f32 to vector<2x1x32xf32>
    %2 = arith.mulf %0, %1 : vector<2x1x32xf32>
    %c0_2 = arith.constant 0 : index
    %c0_3 = arith.constant 0 : index
    %c0_4 = arith.constant 0 : index
    %3 = vector.load %arg2[%c0_2, %c0_3, %c0_4] : memref<2x32x8xf32, #tpu.memory_space<vmem>>, vector<2x32x8xf32>
    %c0_5 = arith.constant 0 : index
    %c0_6 = arith.constant 0 : index
    %c0_7 = arith.constant 0 : index
    %4 = vector.load %arg3[%c0_5, %c0_6, %c0_7] : memref<2x16x8xf32, #tpu.memory_space<vmem>>, vector<2x16x8xf32>
    %cst_8 = arith.constant dense<0.000000e+00> : vector<2x1x8xf32>
    %5 = tpu.matmul %2, %3, %cst_8 {dimension_numbers = #tpu.dot_dimension_numbers<[2], [1], [1], [2], [0, 0, 0, 1, 1, 2], [0], [0]>} : vector<2x1x32xf32>, vector<2x32x8xf32>, vector<2x1x8xf32> -> vector<2x1x8xf32>
    %c0_9 = arith.constant 0 : index
    %c0_10 = arith.constant 0 : index
    %c0_11 = arith.constant 0 : index
    %6 = vector.load %arg4[%c0_9, %c0_10, %c0_11] : memref<2x1x8xf32, #tpu.memory_space<vmem>>, vector<2x1x8xf32>
    %7 = arith.mulf %5, %6 : vector<2x1x8xf32>
    %cst_12 = arith.constant dense<0xFF800000> : vector<2x1xf32>
    %8 = vector.multi_reduction <maximumf>, %7, %cst_12 [2] : vector<2x1x8xf32> to vector<2x1xf32>
    %9 = vector.shape_cast %8 : vector<2x1xf32> to vector<2x1x1xf32>
    %10 = vector.broadcast %9 : vector<2x1x1xf32> to vector<2x1x8xf32>
    %11 = arith.subf %7, %10 : vector<2x1x8xf32>
    %12 = math.exp %11 : vector<2x1x8xf32>
    %cst_13 = arith.constant dense<0.000000e+00> : vector<2x1xf32>
    %13 = vector.multi_reduction <add>, %12, %cst_13 [2] : vector<2x1x8xf32> to vector<2x1xf32>
    %14 = vector.shape_cast %13 : vector<2x1xf32> to vector<2x1x1xf32>
    %cst_14 = arith.constant dense<0.000000e+00> : vector<2x1x16xf32>
    %15 = tpu.matmul %12, %4, %cst_14 {dimension_numbers = #tpu.dot_dimension_numbers<[2], [2], [1], [1], [0, 0, 0, 1, 1, 1], [0], [0]>} : vector<2x1x8xf32>, vector<2x16x8xf32>, vector<2x1x16xf32> -> vector<2x1x16xf32>
    %16 = vector.broadcast %14 : vector<2x1x1xf32> to vector<2x1x16xf32>
    %17 = arith.divf %15, %16 : vector<2x1x16xf32>
    %c0_15 = arith.constant 0 : index
    %c0_16 = arith.constant 0 : index
    %c0_17 = arith.constant 0 : index
    %18 = vector.load %arg5[%c0_15, %c0_16, %c0_17] : memref<2x1x16xf32, #tpu.memory_space<vmem>>, vector<2x1x16xf32>
    tpu.vector_store %arg5[%c0_15, %c0_16, %c0_17], %17 {strides = array<i32>} : memref<2x1x16xf32, #tpu.memory_space<vmem>>, vector<2x1x16xf32>,
    return
  }
  func.func @transform_0(%arg0: i32) -> (i32, i32, i32) {
    %c0_i32 = arith.constant 0 : i32
    %c0_i32_0 = arith.constant 0 : i32
    %c0_i32_1 = arith.constant 0 : i32
    return %arg0, %c0_i32, %c0_i32_0 : i32, i32, i32
  }
  func.func @transform_1(%arg0: i32) -> (i32, i32, i32) {
    %c0_i32 = arith.constant 0 : i32
    %c0_i32_0 = arith.constant 0 : i32
    %c0_i32_1 = arith.constant 0 : i32
    return %arg0, %c0_i32, %c0_i32_0 : i32, i32, i32
  }
  func.func @transform_2(%arg0: i32) -> (i32, i32, i32) {
    %c0_i32 = arith.constant 0 : i32
    %c0_i32_0 = arith.constant 0 : i32
    %c0_i32_1 = arith.constant 0 : i32
    return %arg0, %c0_i32, %c0_i32_0 : i32, i32, i32
  }
  func.func @transform_3(%arg0: i32) -> (i32, i32, i32) {
    %c0_i32 = arith.constant 0 : i32
    %c0_i32_0 = arith.constant 0 : i32
    %c0_i32_1 = arith.constant 0 : i32
    return %arg0, %c0_i32, %c0_i32_0 : i32, i32, i32
  }
  func.func @transform_4(%arg0: i32) -> (i32, i32, i32) {
    %c0_i32 = arith.constant 0 : i32
    %c0_i32_0 = arith.constant 0 : i32
    %c0_i32_1 = arith.constant 0 : i32
    return %arg0, %c0_i32, %c0_i32_0 : i32, i32, i32
  }
}

</mosaic_0001>

<bundles_post_ra>
// kernel: tpu_custom_call.1
= control target key start
LH: loop header
LB: loop body
LE: loop exit
PB: predicated region body
PF: predicated region fallthrough
CT: control target
= control target key end

     0   :  { %v481_v2 = vmov 0.0   ;;  %s576_s0 = inlined_call_operand.vmem [shape: f32[2,1,32], index: 0, kind: input, shape index: {}]   ;;  %s577_s1 = inlined_call_operand.vmem [shape: f32[2,32,8], index: 1, kind: input, shape index: {}]   ;;  %s578_s2 = inlined_call_operand.vmem [shape: f32[2,16,8], index: 2, kind: input, shape index: {}]   ;;  %s579_s3 = inlined_call_operand.vmem [shape: f32[2,1,8], index: 3, kind: input, shape index: {}]   ;;  %s580_s4 = inlined_call_operand.hbm [shape: f32[2,1,16], index: 4, kind: output, shape index: {}]  }
   0x1   :  { %v25_v0 = vld [vmem:[%s577_s1 + $0x18] sm:$0xff]  ;;  %410 = vmatprep.subr.mxu0 %v481_v2  ;;  %421 = vmatprep.subr.mxu1 %v481_v2  ;;  %v24_v3 = vld [vmem:[%s577_s1 + $0x10] sm:$0xff]  ;;  %v18_v5 = vld [vmem:[%s576_s0] sm:$0x1] }
   0x2   :  { %v29_v1 = vld [vmem:[%s577_s1 + $0x38] sm:$0xff]  ;;  %v28_v4 = vld [vmem:[%s577_s1 + $0x30] sm:$0xff]  ;;  %411 = vmatpush3.msra.mxu0 %v25_v0  ;;  %v23_v6 = vld [vmem:[%s577_s1 + $0x8] sm:$0xff] }
   0x3   :  { %422 = vmatpush3.msra.mxu1 %v29_v1  ;;  %412 = vmatprep.subr.mxu0 %v481_v2 }
   0x4   :  { %423 = vmatprep.subr.mxu1 %v481_v2 }
   0x5   :  { %9 = vsyncpa [#allocation3], 0  ;;  %413 = vmatpush3.msra.mxu0 %v24_v3  ;;  %424 = vmatpush3.msra.mxu1 %v28_v4  ;;  %v27_v7 = vld [vmem:[%s577_s1 + $0x28] sm:$0xff]  ;;  %v19_v8 = vld [vmem:[%s576_s0 + $0x1] sm:$0x1]  ;;  %vm482_vm0 = vmmov 0  }
   0x6   :  { %414 = vmatprep.subr.mxu0 %v481_v2  ;;  %425 = vmatprep.subr.mxu1 %v481_v2  ;;  %v22_v9 = vld [vmem:[%s577_s1] sm:$0xff]  ;;  %v20_v10 = vmul.f32 0.17677669, %v18_v5  ;;  %vm34_vm1 = vcmask 261120   ;;  %v21_v12 = vmul.f32 0.17677669, %v19_v8 }
   0x7   :  { %415 = vmatpush3.msra.mxu0 %v23_v6  ;;  %418 = vmatprep.mubr.msk.f32.mxu0 %vm482_vm0, %v481_v2  ;;  %v26_v11 = vld [vmem:[%s577_s1 + $0x20] sm:$0xff]  ;;  %vm185_vm2 = vcmask 57344   ;;  %v31_v23 = vld [vmem:[%s578_s2 + $0x8] sm:$0xff]  ;;  %vm204_vm3 = vcmask 64512   ;;  %v33_v24 = vld [vmem:[%s578_s2 + $0x18] sm:$0xff]  ;;  %vm367_vm4 = vcmask 122880  }
   0x8   :  { %416 = vmatprep.subr.mxu0 %v481_v2  ;;  %426 = vmatpush3.msra.mxu1 %v27_v7  ;;  %v181_v13 = vld [vmem:[%s579_s3] sm:$0x1]  ;;  %v182_v15 = vld [vmem:[%s579_s3 + $0x1] sm:$0x1]  ;;  %v32_v26 = vld [vmem:[%s578_s2 + $0x10] sm:$0xff] }
   0x9   :  { %417 = vmatpush3.msra.mxu0 %v22_v9  ;;  %427 = vmatprep.subr.mxu1 %v481_v2  ;;  %v30_v25 = vld [vmem:[%s578_s2] sm:$0xff]  ;;  %s483_s2 = smov [#allocation2]  }
   0xa   :  { %419 = vmatmul.mubr.msk.f32.vlgmr.msra.gmra.mxu0 %vm34_vm1, %v20_v10  ;;  %428 = vmatpush3.msra.mxu1 %v26_v11  ;;  %s375_s18 = sshll.u32 %s483_s2, 4  ;;  %s376_s18 = int_to_ptr.vmem [resolvable:$true] %s375_s18 }
   0xb   :  { %429 = vmatprep.mubr.msk.f32.mxu1 %vm482_vm0, %v481_v2  ;;  %432 = vmatprep.subr.mxu0 %v481_v2  ;;  %s459_s19 = scalar_lea.vmem %s376_s18, 32  ;;  %p464_p1 = scmp.lt.s32.totalorder %s376_s18, %s376_s18 }
   0xc   :  { %430 = vmatmul.mubr.msk.f32.vlgmr.msra.gmra.mxu1 %vm34_vm1, %v21_v12  ;;  %439 = vmatprep.subr.mxu1 %v481_v2  ;;  %p460_p0 = scmp.ne.s32.totalorder %s376_s18, %s459_s19  ;;  %p465_p2 = scmp.lt.s32.totalorder %s459_s19, %s459_s19 }
   0xd   :  { %436 = vmatprep.mubr.msk.f32.mxu0 %vm482_vm0, %v481_v2  ;;  %443 = vmatprep.mubr.msk.f32.mxu1 %vm482_vm0, %v481_v2 }
   0xe   :  { %433 = vmatpush3.xpose.msk.msra.mxu0 %vm204_vm3, %v31_v23  ;;  %440 = vmatpush3.xpose.msk.msra.mxu1 %vm204_vm3, %v33_v24  ;;  %p466_p3 = por %p465_p2, %p464_p1 }
   0xf   :  { %434 = vmatprep.subr.mxu0 %v481_v2  ;;  %441 = vmatprep.subr.mxu1 %v481_v2 }
  0x10   :  { %p467_p4 = pnand %p466_p3, %p460_p0 }
  0x12   :  { %435 = vmatpush3.xpose.msk.msra.mxu0 %vm204_vm3, %v30_v25  ;;  %442 = vmatpush3.xpose.msk.msra.mxu1 %vm204_vm3, %v32_v26 }
  0xca   :  { %v104_v14 = vpop.f32.mrf.mxu0 }
  0xcb   :  { %v183_v16 = vmul.f32 %v181_v13, %v104_v14 }
  0xcc   :  { %v420_v17 = vpop.f32.mrf.mxu0  ;;  %v177_v18 = vpop.f32.mrf.mxu1 }
  0xcd   :  { %v184_v19 = vmul.f32 %v182_v15, %v177_v18  ;;  %v186_v20 = vsel %vm185_vm2, %v183_v16, -inf }
  0xce   :  { %v431_v21 = vpop.f32.mrf.mxu1  ;;  %187 = vmax.xlane.f32.xlu0 %v186_v20 }
  0xcf   :  { %v189_v22 = vsel %vm185_vm2, %v184_v19, -inf }
  0xd2   :  { %190 = vmax.xlane.f32.xlu0 %v189_v22 }
 0x157   :  { %v188_v27 = vpop.xlane.xlu0 %187 }
 0x158   :  { %v192_v28 = vsub.f32 %v183_v16, %v188_v27 }
 0x15a   :  { %v194_v29 = vmul.f32 1.442695, %v192_v28 }
 0x15b   :  { %v191_v30 = vpop.xlane.xlu0 %190 }
 0x15c   :  { %451 = vpow2.f32 %v194_v29  ;;  %v193_v31 = vsub.f32 %v184_v19, %v191_v30 }
 0x15e   :  { %v196_v32 = vmul.f32 1.442695, %v193_v31 }
 0x160   :  { %453 = vpow2.f32 %v196_v32 }
 0x169   :  { %v452_v33 = vpop.eup %451 }
 0x16a   :  { %437 = vmatmul.mubr.msk.f32.vlgmr.msra.gmra.mxu0 %vm204_vm3, %v452_v33  ;;  %v198_v34 = vsel %vm185_vm2, %v452_v33, 0.0 }
 0x16b   :  { %199 = vadd.xlane.f32.xlu1 %v198_v34 }
 0x16d   :  { %v454_v35 = vpop.eup %453 }
 0x16e   :  { %444 = vmatmul.mubr.msk.f32.vlgmr.msra.gmra.mxu1 %vm204_vm3, %v454_v35  ;;  %v201_v36 = vsel %vm185_vm2, %v454_v35, 0.0 }
 0x16f   :  { %202 = vadd.xlane.f32.xlu1 %v201_v36 }
 0x1f4   :  { %v200_v37 = vpop.xlane.xlu1 %199 }
 0x1f5   :  { %455 = vrcp.f32 %v200_v37 }
 0x1f8   :  { %v203_v38 = vpop.xlane.xlu1 %202 }
 0x1f9   :  { %457 = vrcp.f32 %v203_v38 }
 0x202   :  { %v456_v39 = vpop.eup %455 }
 0x206   :  { %v458_v43 = vpop.eup %457 }
 0x22a   :  { %v280_v40 = vpop.f32.mrf.mxu0 }
 0x22b   :  { %v364_v41 = vmul.f32 %v456_v39, %v280_v40 }
 0x22c   :  { %v438_v42 = vpop.f32.mrf.mxu0 }
 0x22d   :  { %368 = vst.msk [vmem:[#allocation2] sm:$0x1] %vm367_vm4, %v364_v41 }
 0x22e   :  { %v359_v44 = vpop.f32.mrf.mxu1 }
 0x22f   :  { %v366_v45 = vmul.f32 %v458_v43, %v359_v44 }
 0x230   :  { %v445_v46 = vpop.f32.mrf.mxu1 }
 0x231   :  { %369 = vst.msk [vmem:[#allocation2 + $0x1] sm:$0x1] %vm367_vm4, %v366_v45 }
 0x232   :  { %470 = shalt.err (!%p467_p4)
}
 0x233   :  { %s484_s20 = smov 16   ;;  %s485_s21 = smov 1  }
 0x234   :  { %381 = dma.vmem_to_hbm [thread:$0]  %s376_s18, 32, %s580_s4, [#allocation3], %s484_s20, %s484_s20, %s485_s21  }
 0x235   :  { %479 = dma.done.wait [#allocation3], 32  }
 0x236   :  { %480 = vsyncadd [#allocation3], 4294967264 }
 0x237   :  { %385 = vsyncpa [#allocation3], 1 }

</bundles_post_ra>
